<compile_context>
chip_gen: v6e
topology: v6e:2x2x1
jax: 0.10.0
libtpu: 0.0.40
codegen_flags: <defaults>
</compile_context>

<pallas_src>
import numpy as np
import jax
import jax.numpy as jnp
from jax.experimental import pallas as pl
from jax.experimental.pallas import tpu as pltpu


def upsample1d_kernel(x_ref, w_ref, s_ref, b_ref, o_ref):
    # x_ref : (1, C, L)      one batch element
    # w_ref : (4C, C)        stacked transposed weights [w1^T; w3^T; w2^T; w0^T]
    # s_ref : (2L, 2L)       combined even/odd interleave scatter [S_even; S_odd]
    # b_ref : (C, 1)         bias
    # o_ref : (1, C, 2L)     final interleaved output
    x = x_ref[0]                                   # (C, L)
    C, L = x.shape
    f32 = jnp.float32

    # Fused channel mixing: one (4C, C) @ (C, L) matmul on the MXU.
    p = jnp.dot(w_ref[...], x, preferred_element_type=f32)          # (4C, L)
    p1 = p[0 * C:1 * C]   # w1^T x  -> even cols, tap l = m
    p3 = p[1 * C:2 * C]   # w3^T x  -> even cols, tap l = m-1
    p2 = p[2 * C:3 * C]   # w2^T x  -> odd  cols, tap l = m
    p0 = p[3 * C:4 * C]   # w0^T x  -> odd  cols, tap l = m+1

    # +-1 column shifts with zero boundary (implements the ConvTranspose1d padding) done as
    # cheap lane concats on the VPU/XLU instead of extra scatter matmuls.
    zcol = jnp.zeros((C, 1), f32)
    even = p1 + jnp.concatenate([zcol, p3[:, :L - 1]], axis=-1)     # out[:, 2m]
    odd = p2 + jnp.concatenate([p0[:, 1:], zcol], axis=-1)          # out[:, 2m+1]

    # Single interleave matmul: [even | odd] (C, 2L) @ S (2L, 2L) -> final (C, 2L) layout.
    eo = jnp.concatenate([even, odd], axis=-1)                      # (C, 2L)
    out = jnp.dot(eo, s_ref[...], preferred_element_type=f32)       # (C, 2L)

    o_ref[0] = (out + b_ref[...]).astype(o_ref.dtype)


def upsample1d(x, weight, bias):
    """ConvTranspose1d(dim, dim, 4, stride=2, padding=1) forward.

    x:      (N, C, L)         float32
    weight: (C_in, C_out, 4)  PyTorch ConvTranspose1d weight layout
    bias:   (C_out,)
    returns (N, C, 2*L)
    """
    N, C, L = x.shape
    assert weight.shape == (C, C, 4), weight.shape
    f32 = jnp.float32

    # --- Glue (precomputed once, resident across the grid) ---
    wt = jnp.transpose(weight, (2, 1, 0)).astype(f32)                # wt[k] = w[:,:,k]^T (Cout, Cin)
    wstack = jnp.concatenate([wt[1], wt[3], wt[2], wt[0]], axis=0)   # (4C, C)
    b2 = bias.reshape(C, 1).astype(f32)

    # Combined interleave scatter: row m -> col 2m (even half), row L+m -> col 2m+1 (odd half).
    m = jnp.arange(L)[:, None]          # (L, 1)
    t = jnp.arange(2 * L)[None, :]      # (1, 2L)
    s_even = (t == 2 * m).astype(f32)       # (L, 2L)
    s_odd = (t == 2 * m + 1).astype(f32)    # (L, 2L)
    s_cat = jnp.concatenate([s_even, s_odd], axis=0)                 # (2L, 2L)

    flops = 2 * N * (4 * C) * C * L + 2 * N * C * (2 * L) * (2 * L)
    bytes_accessed = 4 * (N * C * L + N * C * 2 * L + 4 * C * C + 2 * L * 2 * L + C)

    out = pl.pallas_call(
        upsample1d_kernel,
        out_shape=jax.ShapeDtypeStruct((N, C, 2 * L), x.dtype),
        grid_spec=pltpu.PrefetchScalarGridSpec(
            num_scalar_prefetch=0,
            grid=(N,),
            in_specs=[
                pl.BlockSpec((1, C, L), lambda n: (n, 0, 0)),
                pl.BlockSpec((4 * C, C), lambda n: (0, 0)),
                pl.BlockSpec((2 * L, 2 * L), lambda n: (0, 0)),
                pl.BlockSpec((C, 1), lambda n: (0, 0)),
            ],
            out_specs=pl.BlockSpec((1, C, 2 * L), lambda n: (n, 0, 0)),
        ),
        compiler_params=pltpu.CompilerParams(dimension_semantics=("parallel",)),
        cost_estimate=pl.CostEstimate(
            flops=int(flops), transcendentals=0, bytes_accessed=int(bytes_accessed)
        ),
    )(x.astype(f32), wstack, s_cat, b2)

    return out


def ref_conv_transpose1d(x, w, b, stride=2, padding=1):
    """Brute-force numpy reference for ConvTranspose1d."""
    N, Cin, L = x.shape
    _, Cout, K = w.shape
    Lout = (L - 1) * stride - 2 * padding + K
    out = np.zeros((N, Cout, Lout), dtype=np.float64)
    for n in range(N):
        for ci in range(Cin):
            for l in range(L):
                for k in range(K):
                    tt = l * stride - padding + k
                    if 0 <= tt < Lout:
                        out[n, :, tt] += x[n, ci, l] * w[ci, :, k]
    out += b[None, :, None]
    return out


if __name__ == "__main__":
    batch, dim, length = 2, 8, 16

    key = jax.random.PRNGKey(0)
    kx, kw, kb = jax.random.split(key, 3)

    # Deterministic PyTorch-style init: uniform(+-1/sqrt(fan_in)), fan_in = dim * K
    bound = 1.0 / np.sqrt(dim * 4)
    x = jax.random.normal(kx, (batch, dim, length), dtype=jnp.float32)
    weight = jax.random.uniform(kw, (dim, dim, 4), minval=-bound, maxval=bound,
                                dtype=jnp.float32)
    bias = jax.random.uniform(kb, (dim,), minval=-bound, maxval=bound,
                              dtype=jnp.float32)

    out = upsample1d(x, weight, bias)
    out = jax.block_until_ready(out)

    ref = ref_conv_transpose1d(np.asarray(x), np.asarray(weight), np.asarray(bias))
    assert out.shape == (batch, dim, 2 * length), out.shape
    np.testing.assert_allclose(np.asarray(out), ref, rtol=5e-4, atol=5e-4)

    print("KERNEL_OK")
</pallas_src>

<mosaic_0001>
module attributes {stable_mosaic.version = 11 : i64} {
  func.func @upsample1d_kernel(%arg0: i32, %arg1: memref<1x8x16xf32, #tpu.memory_space<vmem>>, %arg2: memref<32x8xf32, #tpu.memory_space<vmem>>, %arg3: memref<32x32xf32, #tpu.memory_space<vmem>>, %arg4: memref<8x1xf32, #tpu.memory_space<vmem>>, %arg5: memref<1x8x32xf32, #tpu.memory_space<vmem>>) attributes {dimension_semantics = [#tpu.dimension_semantics<parallel>], iteration_bounds = array<i64: 2>, scalar_prefetch = 0 : i64, scratch_operands = 0 : i64, tpu.core_type = #tpu.core_type<tc>, window_params = [{transform_indices = @transform_0, window_bounds = array<i64: 1, 8, 16>}, {pipeline_mode = #tpu.pipeline_mode<synchronous>, transform_indices = @transform_1, window_bounds = array<i64: 32, 8>}, {pipeline_mode = #tpu.pipeline_mode<synchronous>, transform_indices = @transform_2, window_bounds = array<i64: 32, 32>}, {pipeline_mode = #tpu.pipeline_mode<synchronous>, transform_indices = @transform_3, window_bounds = array<i64: 8, 1>}, {transform_indices = @transform_4, window_bounds = array<i64: 1, 8, 32>}]} {
    %c0 = arith.constant 0 : index
    %c0_0 = arith.constant 0 : index
    %c0_1 = arith.constant 0 : index
    %0 = vector.load %arg1[%c0, %c0_0, %c0_1] : memref<1x8x16xf32, #tpu.memory_space<vmem>>, vector<1x8x16xf32>
    %1 = vector.shape_cast %0 : vector<1x8x16xf32> to vector<8x16xf32>
    %c0_2 = arith.constant 0 : index
    %c0_3 = arith.constant 0 : index
    %2 = vector.load %arg2[%c0_2, %c0_3] : memref<32x8xf32, #tpu.memory_space<vmem>>, vector<32x8xf32>
    %cst = arith.constant dense<0.000000e+00> : vector<32x16xf32>
    %3 = tpu.matmul %2, %1, %cst {dimension_numbers = #tpu.dot_dimension_numbers<[1], [0], [0], [1], [0, 0, 1, 1], [], []>} : vector<32x8xf32>, vector<8x16xf32>, vector<32x16xf32> -> vector<32x16xf32>
    %4 = vector.extract_strided_slice %3 {offsets = [0, 0], sizes = [8, 16], strides = [1, 1]} : vector<32x16xf32> to vector<8x16xf32>
    %5 = vector.extract_strided_slice %3 {offsets = [8, 0], sizes = [8, 16], strides = [1, 1]} : vector<32x16xf32> to vector<8x16xf32>
    %6 = vector.extract_strided_slice %3 {offsets = [16, 0], sizes = [8, 16], strides = [1, 1]} : vector<32x16xf32> to vector<8x16xf32>
    %7 = vector.extract_strided_slice %3 {offsets = [24, 0], sizes = [8, 16], strides = [1, 1]} : vector<32x16xf32> to vector<8x16xf32>
    %cst_4 = arith.constant 0.000000e+00 : f32
    %8 = vector.broadcast %cst_4 : f32 to vector<8x1xf32>
    %9 = vector.extract_strided_slice %5 {offsets = [0, 0], sizes = [8, 15], strides = [1, 1]} : vector<8x16xf32> to vector<8x15xf32>
    %10 = tpu.concatenate %8, %9 in 1 : vector<8x1xf32>, vector<8x15xf32> -> vector<8x16xf32>
    %11 = arith.addf %4, %10 : vector<8x16xf32>
    %12 = vector.extract_strided_slice %7 {offsets = [0, 1], sizes = [8, 15], strides = [1, 1]} : vector<8x16xf32> to vector<8x15xf32>
    %13 = tpu.concatenate %12, %8 in 1 : vector<8x15xf32>, vector<8x1xf32> -> vector<8x16xf32>
    %14 = arith.addf %6, %13 : vector<8x16xf32>
    %15 = tpu.concatenate %11, %14 in 1 : vector<8x16xf32>, vector<8x16xf32> -> vector<8x32xf32>
    %c0_5 = arith.constant 0 : index
    %c0_6 = arith.constant 0 : index
    %16 = vector.load %arg3[%c0_5, %c0_6] : memref<32x32xf32, #tpu.memory_space<vmem>>, vector<32x32xf32>
    %cst_7 = arith.constant dense<0.000000e+00> : vector<8x32xf32>
    %17 = tpu.matmul %15, %16, %cst_7 {dimension_numbers = #tpu.dot_dimension_numbers<[1], [0], [0], [1], [0, 0, 1, 1], [], []>} : vector<8x32xf32>, vector<32x32xf32>, vector<8x32xf32> -> vector<8x32xf32>
    %c0_8 = arith.constant 0 : index
    %c0_9 = arith.constant 0 : index
    %18 = vector.load %arg4[%c0_8, %c0_9] : memref<8x1xf32, #tpu.memory_space<vmem>>, vector<8x1xf32>
    %19 = vector.broadcast %18 : vector<8x1xf32> to vector<8x32xf32>
    %20 = arith.addf %17, %19 : vector<8x32xf32>
    %c0_10 = arith.constant 0 : index
    %c0_11 = arith.constant 0 : index
    %c0_12 = arith.constant 0 : index
    %21 = vector.load %arg5[%c0_10, %c0_11, %c0_12] : memref<1x8x32xf32, #tpu.memory_space<vmem>>, vector<1x8x32xf32>
    %22 = vector.shape_cast %21 : vector<1x8x32xf32> to vector<8x32xf32>
    %23 = vector.shape_cast %20 : vector<8x32xf32> to vector<1x8x32xf32>
    tpu.vector_store %arg5[%c0_10, %c0_11, %c0_12], %23 {strides = array<i32>} : memref<1x8x32xf32, #tpu.memory_space<vmem>>, vector<1x8x32xf32>,
    return
  }
  func.func @transform_0(%arg0: i32) -> (i32, i32, i32) {
    %c0_i32 = arith.constant 0 : i32
    %c0_i32_0 = arith.constant 0 : i32
    %c0_i32_1 = arith.constant 0 : i32
    return %arg0, %c0_i32, %c0_i32_0 : i32, i32, i32
  }
  func.func @transform_1(%arg0: i32) -> (i32, i32) {
    %c0_i32 = arith.constant 0 : i32
    %c0_i32_0 = arith.constant 0 : i32
    %c0_i32_1 = arith.constant 0 : i32
    return %c0_i32, %c0_i32_0 : i32, i32
  }
  func.func @transform_2(%arg0: i32) -> (i32, i32) {
    %c0_i32 = arith.constant 0 : i32
    %c0_i32_0 = arith.constant 0 : i32
    %c0_i32_1 = arith.constant 0 : i32
    return %c0_i32, %c0_i32_0 : i32, i32
  }
  func.func @transform_3(%arg0: i32) -> (i32, i32) {
    %c0_i32 = arith.constant 0 : i32
    %c0_i32_0 = arith.constant 0 : i32
    %c0_i32_1 = arith.constant 0 : i32
    return %c0_i32, %c0_i32_0 : i32, i32
  }
  func.func @transform_4(%arg0: i32) -> (i32, i32, i32) {
    %c0_i32 = arith.constant 0 : i32
    %c0_i32_0 = arith.constant 0 : i32
    %c0_i32_1 = arith.constant 0 : i32
    return %arg0, %c0_i32, %c0_i32_0 : i32, i32, i32
  }
}

</mosaic_0001>

<bundles_post_ra>
// kernel: tpu_custom_call.1
= control target key start
LH: loop header
LB: loop body
LE: loop exit
PB: predicated region body
PF: predicated region fallthrough
CT: control target
= control target key end

     0   :  { %9 = vsyncpa [#allocation3], 0  ;;  %s779_s0 = inlined_call_operand.vmem [shape: f32[2,8,16], index: 0, kind: input, shape index: {}]   ;;  %s780_s1 = inlined_call_operand.vmem [shape: f32[32,8], index: 1, kind: input, shape index: {}]   ;;  %s781_s2 = inlined_call_operand.vmem [shape: f32[32,32], index: 2, kind: input, shape index: {}]   ;;  %s782_s3 = inlined_call_operand.vmem [shape: f32[8,1], index: 3, kind: input, shape index: {}]   ;;  %s783_s4 = inlined_call_operand.hbm [shape: f32[2,8,32], index: 4, kind: output, shape index: {}]  }
   0x1   :  { %11 = vsyncpa [#allocation3 + $0x1], 0  ;;  %s659_s15 = smov 0   ;;  %s661_s16 = smov 0  }
   0x2   :  { %s663_s17 = smov 0   ;;  %s665_s18 = smov 0  }
   0x3 LB: > { %s680_s19 = sadd.s32 4294967295, %s625_s18   ;;  %s474_s20 = sadd.s32 4294967294, %s625_s18   ;;  %s625_s18 = sphi %s665_s18, %s789_s18   ;;  %s621_s17 = sphi %s663_s17, %s788_s17   ;;  %s617_s16 = sphi %s661_s16, %s787_s16   ;;  %s613_s15 = sphi %s659_s15, %s786_s15  }
   0x4   : > { %s684_s21 = sadd.s32 1, %s625_s18   ;;  %s113_s22 = sadd.s32 1, %s621_s17 }
   0x5   : > { %s110_s23 = ssub.s32 %s625_s18, %s684_s21  ;;  %p123_p0 = scmp.ne.s32.totalorder %s621_s17, %s617_s16 }
   0x6   : > { %p111_p1 = scmp.eq.s32.totalorder %s110_s23, 0  ;;  %p124_p2 = scmp.eq.s32.totalorder %s680_s19, 1 }
   0x7   : > { %p129_p3 = scmp.ne.s32.totalorder %s617_s16, %s613_s15  ;;  %p130_p4 = scmp.eq.s32.totalorder %s474_s20, 1 }
   0x8   : > { %s695_s24 = scalar_select %p111_p1, %s621_s17, %s113_s22  }
   0x9   : > { %p697_p5 = por %p124_p2, %p123_p0  ;;  %p701_p6 = por %p130_p4, %p129_p3 }
   0xa   : > { %p477_p7 = scmp.ge.s32.totalorder %s625_s18, 1  ;;  %p164_p8 = scmp.lt.s32.totalorder %s625_s18, 3 }
   0xc   : > { %p165_p9 = pnand %p477_p7, %p164_p8 }
   0xd   : > { %p189_p10 = scmp.lt.s32.totalorder (!%p165_p9), %s680_s19, 1  ;;  %s186_s10 = sand.u32 (!%p165_p9), 1, %s617_s16  }
   0xe   : > { %168 = sbr.rel (%p165_p9) target bundleno = 665 (0x299), region = 36  ;;  %s478_s11 = sshll.u32 (!%p165_p9), %s186_s10, 3 }
   0xf   : > { %s486_s12 = sshll.u32 (!%p165_p9), %s680_s19, 7  ;;  %s188_s13 = scalar_lea.vmem (!%p165_p9), [#allocation2], %s478_s11 }
  0x10   : > { %s415_s14 = sshll.u32 (!%p165_p9), %s188_s13, 4  ;;  %s744_s23 = scalar_lea.hbm (!%p165_p9), %s783_s4, %s486_s12  ;;  %s416_s14 = int_to_ptr.vmem [resolvable:$true] %s415_s14 }
  0x11   : > { %s402_s27 = scalar_lea.sflag (!%p165_p9), [#allocation3], %s186_s10  ;;  %s565_s28 = scalar_lea.vmem (!%p165_p9), %s416_s14, 128 }
  0x12   : > { %p566_p11 = scmp.ne.s32.totalorder (!%p165_p9), %s416_s14, %s565_s28 }
  0x13   : > { %v194_v0 = vld [vmem:[%s780_s1] sm:$0xff]  ;;  %vm198_vm0 = vcmask 64512   ;;  %s190_s29 = scalar_select %p189_p10, %s680_s19, 1  ;;  %v195_v2 = vld [vmem:[%s780_s1 + $0x8] sm:$0xff]  ;;  %v196_v3 = vld [vmem:[%s780_s1 + $0x10] sm:$0xff]  ;;  %v627_v6 = vmov 0.0  }
  0x14   : > { %501 = vmatprep.mubr.msk.f32.mxu0 %vm198_vm0, %v194_v0  ;;  %v197_v4 = vld [vmem:[%s780_s1 + $0x18] sm:$0xff]  ;;  %507 = vmatprep.subr.mxu1 %v627_v6  ;;  %v318_v7 = vld [vmem:[%s781_s2 + $0x10] sm:$0xff]  ;;  %v317_v9 = vld [vmem:[%s781_s2 + $0x8] sm:$0xff]  ;;  %vm630_vm1 = vmmov 0   ;;  %v631_v13 = vmov 0   ;;  %vm307_vm2 = vcmask 121856   ;;  %p567_p12 = pnand %p566_p11, %p697_p5 }
  0x15   : > { %s479_s30 = sshll.u32 %s190_s29, 3  ;;  %v319_v5 = vld [vmem:[%s781_s2 + $0x18] sm:$0xff]  ;;  %s628_s29 = smov 127   ;;  %v316_v12 = vld [vmem:[%s781_s2] sm:$0xff]  ;;  %515 = vmatprep.mubr.msk.f32.mxu1 %vm630_vm1, %v627_v6  ;;  %563 = vset.pattern.permute.xlu1 %v631_v13  ;;  %vm300_vm3 = vcmask 7168   ;;  %vm314_vm4 = vcmask 130048  }
  0x16   : > { %s192_s7 = scalar_lea.vmem %s779_s0, %s479_s30  ;;  %508 = vmatpush3.msra.mxu1 %v319_v5  ;;  %s629_s30 = smov 1   ;;  %564 = vset.pattern.permute.xlu0 %v631_v13  ;;  %v320_v18 = vld [vmem:[%s782_s3] sm:$0xff]  ;;  %vm326_vm5 = vcmask 261120  }
  0x17   : > { %v193_v1 = vld [vmem:[%s192_s7] sm:$0xff]  ;;  %509 = vmatprep.subr.mxu1 %v627_v6  ;;  %s632_s7 = smov 16   ;;  %p568_p13 = pneg %p567_p12 }
  0x18   : > { %499 = vmatprep.subr.mxu0 %v193_v1  ;;  %510 = vmatpush3.msra.mxu1 %v318_v7 }
  0x19   : > { %500 = vmatpush3.msra.mxu0 %v193_v1  ;;  %511 = vmatprep.subr.mxu1 %v627_v6 }
  0x1a   : > { %502 = vmatmul.mubr.msk.f32.vlgmr.msra.gmra.mxu0 %vm198_vm0, %v195_v2  ;;  %512 = vmatpush3.msra.mxu1 %v317_v9 }
  0x1b   : > { %504 = vmatprep.mubr.msk.f32.mxu0 %vm198_vm0, %v196_v3  ;;  %513 = vmatprep.subr.mxu1 %v627_v6 }
  0x1c   : > { %514 = vmatpush3.msra.mxu1 %v316_v12 }
  0x1e   : > { %505 = vmatmul.mubr.msk.f32.gmra.mxu0 %vm198_vm0, %v197_v4 }
  0xda   : > { %v503_v8 = vpop.f32.mrf.mxu0 }
  0xdc   : > { %v277_v10 = vpop.f32.mrf.mxu0 }
  0xde   : > { %v506_v11 = vpop.f32.mrf.mxu0 }
  0xdf   : > { %304 = vrot.lane.b32.xlu0 %v506_v11, %s628_s29  ;;  %s633_s29 = smov [#allocation2]  }
  0xe0   : > { %v287_v15 = vpop.f32.mrf.mxu0  ;;  %s569_s19 = sshll.u32 %s633_s29, 4  ;;  %s570_s19 = int_to_ptr.vmem [resolvable:$false] %s569_s19 }
  0xe1   : > { %p572_p0 = scmp.lt.s32.totalorder %s416_s14, %s570_s19 }
  0xe3   : > { %297 = vrot.lane.b32.xlu0 %v503_v8, %s629_s30  ;;  %s571_s30 = scalar_lea.vmem %s570_s19, 256 }
  0xe4   : > { %p573_p1 = scmp.lt.s32.totalorder %s571_s30, %s565_s28 }
  0xe6   : > { %p574_p2 = por %p573_p1, %p572_p0 }
  0xe8   : > { %p575_p3 = pnand %p574_p2, %p568_p13 }
 0x151   : > { %v305_v14 = vpop.permute.xlu0 %304 }
 0x152   : > { %v308_v16 = vsel %vm307_vm2, %v305_v14, 0.0 }
 0x153   : > { %v309_v17 = vadd.f32 %v308_v16, %v287_v15 }
 0x155   : > { %311 = vrot.lane.b32.xlu1 %v309_v17, %s632_s7  ;;  %v298_v19 = vpop.permute.xlu0 %297 }
 0x156   : > { %v301_v20 = vsel %vm300_vm3, 0.0, %v298_v19 }
 0x157   : > { %v302_v21 = vadd.f32 %v301_v20, %v277_v10 }
 0x159   : > { %323 = vperm.xlu1 %563, %v320_v18  }
 0x1c7   : > { %v312_v22 = vpop.permute.xlu1 %311 }
 0x1c8   : > { %v315_v23 = vsel %vm314_vm4, %v302_v21, %v312_v22 }
 0x1c9   : > { %516 = vmatmul.mubr.msk.f32.vlgmr.msra.gmra.mxu1 %vm326_vm5, %v315_v23 }
 0x1d4   : > { %v324_v24 = vpop.permute.xlu1 %323 }
 0x289   : > { %v396_v25 = vpop.f32.mrf.mxu1 }
 0x28a   : > { %v397_v26 = vadd.f32 %v396_v25, %v324_v24 }
 0x28b   : > { %v517_v27 = vpop.f32.mrf.mxu1 }
 0x28c   : > { %400 = vst.msk [vmem:[%s188_s13] sm:$0xff] %vm326_vm5, %v397_v26 }
 0x28d   : > { %578 = shalt.err (!%p575_p3)
}
 0x28e   : > { %s579_s5 = scalar_lea.hbm %s744_s23, 128  ;;  %s583_s8 = scalar_lea.hbm %s783_s4, 256 }
 0x28f   : > { %p580_p4 = scmp.ne.s32.totalorder %s744_s23, %s579_s5  ;;  %p584_p9 = scmp.lt.s32.totalorder %s744_s23, %s783_s4 }
 0x290   : > { %p585_p10 = scmp.lt.s32.totalorder %s583_s8, %s579_s5 }
 0x291   : > { %p581_p7 = pnand %p580_p4, %p697_p5 }
 0x292   : > { %p586_p11 = por %p585_p10, %p584_p9 }
 0x293   : > { %p582_p8 = pneg %p581_p7 }
 0x295   : > { %p587_p12 = pnand %p586_p11, %p582_p8 }
 0x297   : > { %590 = shalt.err (!%p587_p12)
}
 0x298   : > { %518 = dma.vmem_to_hbm [thread:$0]  (%p697_p5), %s416_s14, 128, %s744_s23, %s402_s27  }
 0x299 PF: > { %p524_p13 = scmp.ge.s32.totalorder %s625_s18, 2  ;;  %s427_s11 = sand.u32 1, %s613_s15  }
 0x29a   : > { %s428_s12 = scalar_lea.sflag [#allocation3], %s427_s11 }
 0x29b   : > { %p521_p0 = pnand %p524_p13, %p701_p6 }
 0x29d   : > { %p522_p1 = pneg %p521_p0 }
 0x29f   : > { %608 = dma.done.wait (%p522_p1), %s428_s12, 128  }
 0x2a0   : > { %610 = vsyncadd (%p522_p1), %s428_s12, 4294967168  ;;  %p14_p2 = scmp.ge.s32.totalorder %s684_s21, 4   ;;  %s786_s15 = smov %s617_s16 }
 0x2a1   : > { %s787_s16 = smov %s621_s17  ;;  %s788_s17 = smov %s695_s24 }
 0x2a2   : > { %s789_s18 = smov %s684_s21  ;;  %16 = sbr.rel (!%p14_p2) target bundleno = 3 (0x3), region = 71 }
 0x2a7   :  { %433 = vsyncpa [#allocation3], 1 }
 0x2a8   :  { %435 = vsyncpa [#allocation3 + $0x1], 1 }

</bundles_post_ra>
